<compile_context>
chip_gen: v6e
topology: v6e:2x2x1
jax: 0.10.0
libtpu: 0.0.40
codegen_flags: <defaults>
</compile_context>

<pallas_src>
import jax
import jax.numpy as jnp
from jax.experimental import pallas as pl
from jax.experimental.pallas import tpu as pltpu


def _round_up(x, m):
    return (x + m - 1) // m * m


# ----------------------------- Pallas kernels ------------------------------ #

def _fused_head_kernel(x_ref, w_ref, b_ref, out_ref):
    """out = x @ [Wc | Wb | Wi] + [bc | bb | bi]  (single fused, lane-dense matmul)."""
    out_ref[...] = (
        jnp.dot(x_ref[...], w_ref[...], preferred_element_type=jnp.float32)
        + b_ref[...]
    )


def _fused_head_ctx_kernel(x_ref, gx_ref, wcb_ref, bcb_ref, wid_ref, bid_ref,
                           cb_ref, id_ref):
    """scores|bbox = x @ [Wc | Wb] + b ;  ids = gx @ W_fold + b_fold (ctx_remover folded)."""
    cb_ref[...] = (
        jnp.dot(x_ref[...], wcb_ref[...], preferred_element_type=jnp.float32)
        + bcb_ref[...]
    )
    id_ref[...] = (
        jnp.dot(gx_ref[...], wid_ref[...], preferred_element_type=jnp.float32)
        + bid_ref[...]
    )


# ------------------------------ JAX wrapper -------------------------------- #

def init_params(key, in_channels, id_embedding_size, num_classes=2):
    """Deterministic init mirroring nn.Linear default (uniform +/- 1/sqrt(fan_in))."""
    def linear(k, fan_in, fan_out):
        kw, kb = jax.random.split(k)
        bound = 1.0 / (fan_in ** 0.5)
        w = jax.random.uniform(kw, (fan_out, fan_in), jnp.float32, -bound, bound)
        b = jax.random.uniform(kb, (fan_out,), jnp.float32, -bound, bound)
        return w, b

    k1, k2, k3, k4 = jax.random.split(key, 4)
    return {
        "cls_score": linear(k1, in_channels, num_classes),            # (num_classes, C)
        "bbox_pred": linear(k2, in_channels, num_classes * 4),        # (4*num_classes, C)
        "id_encoder": linear(k3, in_channels, id_embedding_size),     # (E, C)
        "ctx_remover": linear(k4, in_channels * 2, in_channels),      # (C, 2C)
    }


def _pad_lanes(w2d, b1d, out_pad):
    """Pad a (in, out) weight and (out,) bias to out_pad lanes; bias -> (1, out_pad)."""
    out = w2d.shape[1]
    w = jnp.pad(w2d, ((0, 0), (0, out_pad - out)))
    b = jnp.pad(b1d, (0, out_pad - out)).reshape(1, out_pad)
    return w, b


def fast_rcnn_predictor_with_id(params, box_features, box_global_features=None,
                                *, compute_dtype=jnp.bfloat16, max_block_n=512):
    # Glue: flatten (N, C, 1, 1) -> (N, C) exactly like the PyTorch module.
    if box_features.ndim == 4:
        assert tuple(box_features.shape[2:]) == (1, 1)
    x = box_features.reshape(box_features.shape[0], -1).astype(jnp.float32)
    n, c = x.shape

    wc, bc = params["cls_score"]     # (nc, C)
    wb, bb = params["bbox_pred"]     # (4nc, C)
    wi, bi = params["id_encoder"]    # (E, C)
    num_classes = wc.shape[0]
    e = wi.shape[0]

    # Row (sublane) tiling: block multiple of 8, capped; pad N up to a full grid.
    n_blk = min(_round_up(n, 8), max_block_n)
    n_pad = _round_up(n, n_blk)
    if n_pad != n:
        x = jnp.pad(x, ((0, n_pad - n), (0, 0)))
    grid = (n_pad // n_blk,)

    def row_spec(width):
        return pl.BlockSpec((n_blk, width), lambda i: (i, 0))

    def resident(shape):
        # Same block index every grid step -> weight/bias stays resident in VMEM.
        return pl.BlockSpec(shape, lambda i: (0, 0))

    cparams = pltpu.CompilerParams(dimension_semantics=("parallel",))

    if box_global_features is None:
        # ---- Branch 1: all three heads share LHS x -> one fused matmul. ----
        total = num_classes + 4 * num_classes + e
        out_pad = _round_up(total, 128)
        w_fused = jnp.concatenate([wc.T, wb.T, wi.T], axis=1)   # (C, total)
        b_fused = jnp.concatenate([bc, bb, bi])                 # (total,)
        w_fused, b_fused = _pad_lanes(w_fused, b_fused, out_pad)

        xk = x.astype(compute_dtype)
        wk = w_fused.astype(compute_dtype)
        bytes_acc = (xk.size * xk.dtype.itemsize + wk.size * wk.dtype.itemsize
                     + b_fused.size * 4 + n_pad * out_pad * 4)

        out = pl.pallas_call(
            _fused_head_kernel,
            out_shape=jax.ShapeDtypeStruct((n_pad, out_pad), jnp.float32),
            grid=grid,
            in_specs=[row_spec(c), resident((c, out_pad)), resident((1, out_pad))],
            out_specs=row_spec(out_pad),
            compiler_params=cparams,
            cost_estimate=pl.CostEstimate(flops=2 * n_pad * c * out_pad,
                                          transcendentals=0,
                                          bytes_accessed=bytes_acc),
        )(xk, wk, b_fused)

        scores = out[:n, :num_classes]
        bbox = out[:n, num_classes:5 * num_classes]
        ids = out[:n, 5 * num_classes:5 * num_classes + e]
        return scores, bbox, ids

    # ---- Branch 2: cls+bbox fused on x; ctx_remover folded into id_encoder on gx. ----
    gx = box_global_features.reshape(box_global_features.shape[0], -1).astype(jnp.float32)
    assert gx.shape == (n, 2 * c), "ctx_remover expects features of width 2*in_channels"
    if n_pad != n:
        gx = jnp.pad(gx, ((0, n_pad - n), (0, 0)))
    wctx, bctx = params["ctx_remover"]   # (C, 2C), (C,)

    cb_total = 5 * num_classes
    cb_pad = _round_up(cb_total, 128)
    w_cb = jnp.concatenate([wc.T, wb.T], axis=1)                # (C, 5nc)
    b_cb = jnp.concatenate([bc, bb])
    w_cb, b_cb = _pad_lanes(w_cb, b_cb, cb_pad)

    # Fold (exact: no nonlinearity between ctx_remover and id_encoder in this forward):
    #   ids = (gx @ Wctx^T + bctx) @ Wi^T + bi = gx @ (Wctx^T @ Wi^T) + (bctx @ Wi^T + bi)
    id_pad = _round_up(e, 128)
    w_fold = wctx.T @ wi.T                                      # (2C, E), f32 fold in XLA
    b_fold = bctx @ wi.T + bi                                   # (E,)
    w_fold, b_fold = _pad_lanes(w_fold, b_fold, id_pad)

    xk = x.astype(compute_dtype)
    gxk = gx.astype(compute_dtype)
    wcbk = w_cb.astype(compute_dtype)
    wfk = w_fold.astype(compute_dtype)
    bytes_acc = (xk.size * xk.dtype.itemsize + gxk.size * gxk.dtype.itemsize
                 + wcbk.size * wcbk.dtype.itemsize + wfk.size * wfk.dtype.itemsize
                 + (b_cb.size + b_fold.size) * 4
                 + n_pad * (cb_pad + id_pad) * 4)

    cb_out, id_out = pl.pallas_call(
        _fused_head_ctx_kernel,
        out_shape=(jax.ShapeDtypeStruct((n_pad, cb_pad), jnp.float32),
                   jax.ShapeDtypeStruct((n_pad, id_pad), jnp.float32)),
        grid=grid,
        in_specs=[row_spec(c), row_spec(2 * c),
                  resident((c, cb_pad)), resident((1, cb_pad)),
                  resident((2 * c, id_pad)), resident((1, id_pad))],
        out_specs=(row_spec(cb_pad), row_spec(id_pad)),
        compiler_params=cparams,
        cost_estimate=pl.CostEstimate(
            flops=2 * n_pad * (c * cb_pad + 2 * c * id_pad),
            transcendentals=0,
            bytes_accessed=bytes_acc),
    )(xk, gxk, wcbk, b_cb, wfk, b_fold)

    scores = cb_out[:n, :num_classes]
    bbox = cb_out[:n, num_classes:cb_total]
    ids = id_out[:n, :e]
    return scores, bbox, ids


# ------------------------------- reference --------------------------------- #

def _reference(params, box_features, box_global_features=None):
    x = box_features.reshape(box_features.shape[0], -1)
    wc, bc = params["cls_score"]
    wb, bb = params["bbox_pred"]
    wi, bi = params["id_encoder"]
    wx, bx = params["ctx_remover"]
    scores = x @ wc.T + bc
    bbox = x @ wb.T + bb
    if box_global_features is not None:
        no_ctx = box_global_features @ wx.T + bx
        ids = no_ctx @ wi.T + bi
    else:
        ids = x @ wi.T + bi
    return scores, bbox, ids


# ---------------------------------- main ------------------------------------ #

if __name__ == "__main__":
    N = 8               # number of box proposals
    C = 32              # in_channels (box head output channels)
    E = 16              # id_embedding_size
    NUM_CLASSES = 2

    key = jax.random.PRNGKey(0)
    k_params, k_x, k_g = jax.random.split(key, 3)

    params = init_params(k_params, C, E, NUM_CLASSES)

    # Box features arrive as (N, C, 1, 1) from the box head pooling.
    box_features = jax.random.normal(k_x, (N, C, 1, 1), jnp.float32)
    box_global_features = jax.random.normal(k_g, (N, 2 * C), jnp.float32)

    # f32 compute path: tight check of fusion/fold/padding plumbing.
    outs_f32 = (
        fast_rcnn_predictor_with_id(params, box_features, None,
                                    compute_dtype=jnp.float32)
        + fast_rcnn_predictor_with_id(params, box_features, box_global_features,
                                      compute_dtype=jnp.float32)
    )
    # bf16 compute path (default): MXU-friendly on v6e/v7x, f32 accumulation.
    outs_bf16 = (
        fast_rcnn_predictor_with_id(params, box_features, None)
        + fast_rcnn_predictor_with_id(params, box_features, box_global_features)
    )
    jax.block_until_ready((outs_f32, outs_bf16))

    refs = (_reference(params, box_features, None)
            + _reference(params, box_features, box_global_features))

    for got, want in zip(outs_f32, refs):
        assert got.shape == want.shape and got.dtype == want.dtype
        assert jnp.allclose(got, want, atol=1e-3, rtol=1e-3)
    for got, want in zip(outs_bf16, refs):
        assert got.shape == want.shape
        assert jnp.allclose(got, want, atol=5e-2, rtol=5e-2)

    print("KERNEL_OK")
</pallas_src>

<mosaic_0001>
module attributes {stable_mosaic.version = 11 : i64} {
  func.func @_fused_head_kernel(%arg0: i32, %arg1: memref<8x32xf32, #tpu.memory_space<vmem>>, %arg2: memref<32x128xf32, #tpu.memory_space<vmem>>, %arg3: memref<1x128xf32, #tpu.memory_space<vmem>>, %arg4: memref<8x128xf32, #tpu.memory_space<vmem>>) attributes {dimension_semantics = [#tpu.dimension_semantics<parallel>], iteration_bounds = array<i64: 1>, scalar_prefetch = 0 : i64, scratch_operands = 0 : i64, tpu.core_type = #tpu.core_type<tc>, window_params = [{transform_indices = @transform_0, window_bounds = array<i64: 8, 32>}, {pipeline_mode = #tpu.pipeline_mode<synchronous>, transform_indices = @transform_1, window_bounds = array<i64: 32, 128>}, {pipeline_mode = #tpu.pipeline_mode<synchronous>, transform_indices = @transform_2, window_bounds = array<i64: 1, 128>}, {transform_indices = @transform_3, window_bounds = array<i64: 8, 128>}]} {
    %c0 = arith.constant 0 : index
    %c0_0 = arith.constant 0 : index
    %0 = vector.load %arg1[%c0, %c0_0] : memref<8x32xf32, #tpu.memory_space<vmem>>, vector<8x32xf32>
    %c0_1 = arith.constant 0 : index
    %c0_2 = arith.constant 0 : index
    %1 = vector.load %arg2[%c0_1, %c0_2] : memref<32x128xf32, #tpu.memory_space<vmem>>, vector<32x128xf32>
    %cst = arith.constant dense<0.000000e+00> : vector<8x128xf32>
    %2 = tpu.matmul %0, %1, %cst {dimension_numbers = #tpu.dot_dimension_numbers<[1], [0], [0], [1], [0, 0, 1, 1], [], []>} : vector<8x32xf32>, vector<32x128xf32>, vector<8x128xf32> -> vector<8x128xf32>
    %c0_3 = arith.constant 0 : index
    %c0_4 = arith.constant 0 : index
    %3 = vector.load %arg3[%c0_3, %c0_4] : memref<1x128xf32, #tpu.memory_space<vmem>>, vector<1x128xf32>
    %4 = vector.broadcast %3 : vector<1x128xf32> to vector<8x128xf32>
    %5 = arith.addf %2, %4 : vector<8x128xf32>
    %c0_5 = arith.constant 0 : index
    %c0_6 = arith.constant 0 : index
    %6 = vector.load %arg4[%c0_5, %c0_6] : memref<8x128xf32, #tpu.memory_space<vmem>>, vector<8x128xf32>
    tpu.vector_store %arg4[%c0_5, %c0_6], %5 {strides = array<i32>} : memref<8x128xf32, #tpu.memory_space<vmem>>, vector<8x128xf32>,
    return
  }
  func.func @transform_0(%arg0: i32) -> (i32, i32) {
    %c0_i32 = arith.constant 0 : i32
    %c0_i32_0 = arith.constant 0 : i32
    return %arg0, %c0_i32 : i32, i32
  }
  func.func @transform_1(%arg0: i32) -> (i32, i32) {
    %c0_i32 = arith.constant 0 : i32
    %c0_i32_0 = arith.constant 0 : i32
    %c0_i32_1 = arith.constant 0 : i32
    return %c0_i32, %c0_i32_0 : i32, i32
  }
  func.func @transform_2(%arg0: i32) -> (i32, i32) {
    %c0_i32 = arith.constant 0 : i32
    %c0_i32_0 = arith.constant 0 : i32
    %c0_i32_1 = arith.constant 0 : i32
    return %c0_i32, %c0_i32_0 : i32, i32
  }
  func.func @transform_3(%arg0: i32) -> (i32, i32) {
    %c0_i32 = arith.constant 0 : i32
    %c0_i32_0 = arith.constant 0 : i32
    return %arg0, %c0_i32 : i32, i32
  }
}

</mosaic_0001>

<bundles_post_ra>
// kernel: tpu_custom_call.1
= control target key start
LH: loop header
LB: loop body
LE: loop exit
PB: predicated region body
PF: predicated region fallthrough
CT: control target
= control target key end

     0   :  { %8 = vsyncpa [#allocation3], 0  ;;  %s274_s0 = inlined_call_operand.hbm [shape: f32[8,32], index: 0, kind: input, shape index: {}]   ;;  %s275_s1 = inlined_call_operand.hbm [shape: f32[32,128], index: 1, kind: input, shape index: {}]   ;;  %s276_s2 = inlined_call_operand.vmem [shape: f32[1,128], index: 2, kind: input, shape index: {}]   ;;  %s277_s3 = inlined_call_operand.hbm [shape: f32[8,128], index: 3, kind: output, shape index: {}]  }
   0x1   :  { %9 = vsyncpa [#allocation6], 0 }
   0x2   :  { %10 = vsyncpa [#allocation4], 0  ;;  %s235_s12 = smov [#allocation2]   ;;  %s236_s14 = smov [#allocation5]  }
   0x3   :  { %s17_s13 = sshll.u32 %s235_s12, 4  ;;  %s26_s15 = sshll.u32 %s236_s14, 4  ;;  %s18_s13 = int_to_ptr.vmem [resolvable:$true] %s17_s13  ;;  %s27_s15 = int_to_ptr.vmem [resolvable:$true] %s26_s15 }
   0x4   :  { %s177_s16 = scalar_lea.vmem %s18_s13, 128  ;;  %p182_p1 = scmp.lt.s32.totalorder %s18_s13, %s18_s13 }
   0x5   :  { %p178_p0 = scmp.ne.s32.totalorder %s18_s13, %s177_s16  ;;  %p183_p2 = scmp.lt.s32.totalorder %s177_s16, %s177_s16 }
   0x7   :  { %p184_p3 = por %p183_p2, %p182_p1 }
   0x9   :  { %p185_p4 = pnand %p184_p3, %p178_p0 }
   0xb   :  { %188 = shalt.err (!%p185_p4)
}
   0xc   :  { %20 = dma.hbm_to_vmem [thread:$0]  %s274_s0, 128, %s18_s13, [#allocation3]  }
   0xd   :  { %s197_s19 = scalar_lea.vmem %s27_s15, 512  ;;  %p202_p6 = scmp.lt.s32.totalorder %s27_s15, %s27_s15 }
   0xe   :  { %p198_p5 = scmp.ne.s32.totalorder %s27_s15, %s197_s19  ;;  %p203_p7 = scmp.lt.s32.totalorder %s197_s19, %s197_s19 }
  0x10   :  { %p204_p8 = por %p203_p7, %p202_p6 }
  0x12   :  { %p205_p9 = pnand %p204_p8, %p198_p5 }
  0x14   :  { %208 = shalt.err (!%p205_p9)
}
  0x15   :  { %s237_s20 = smov 128   ;;  %s238_s21 = smov 8  }
  0x16   :  { %32 = dma.hbm_to_vmem [thread:$0]  %s275_s1, 512, %s27_s15, [#allocation6], %s237_s20, %s237_s20, %s238_s21  }
  0x17   :  { %229 = dma.done.wait [#allocation3], 128  }
  0x18   :  { %230 = vsyncadd [#allocation3], 4294967168 }
  0x19   :  { %231 = dma.done.wait [#allocation6], 512  }
  0x1a   :  { %232 = vsyncadd [#allocation6], 4294966784  ;;  %v239_v0 = vmov 0.0   ;;  %vm240_vm0 = vmmov 0   ;;  %v45_v1 = vld [vmem:[#allocation5 + $0x18] sm:$0xff]  ;;  %v44_v2 = vld [vmem:[#allocation5 + $0x10] sm:$0xff] }
  0x1b   :  { %151 = vmatprep.subr.mxu0 %v239_v0  ;;  %159 = vmatprep.mubr.msk.f32.mxu0 %vm240_vm0, %v239_v0  ;;  %v43_v3 = vld [vmem:[#allocation5 + $0x8] sm:$0xff]  ;;  %v42_v4 = vld [vmem:[#allocation5] sm:$0xff]  ;;  %v41_v5 = vld [vmem:[#allocation2] sm:$0xff]  ;;  %vm53_vm1 = vcmask 261120   ;;  %s241_s24 = smov [#allocation7]  }
  0x1c   :  { %152 = vmatpush3.msra.mxu0 %v45_v1  ;;  %v144_v6 = vld [vmem:[%s276_s2] ss:$0 sm:$0xff]  ;;  %s134_s25 = sshll.u32 %s241_s24, 4  ;;  %s135_s25 = int_to_ptr.vmem [resolvable:$true] %s134_s25 }
  0x1d   :  { %153 = vmatprep.subr.mxu0 %v239_v0  ;;  %s209_s26 = scalar_lea.vmem %s135_s25, 128  ;;  %p214_p11 = scmp.lt.s32.totalorder %s135_s25, %s135_s25 }
  0x1e   :  { %154 = vmatpush3.msra.mxu0 %v44_v2  ;;  %p210_p10 = scmp.ne.s32.totalorder %s135_s25, %s209_s26  ;;  %p215_p12 = scmp.lt.s32.totalorder %s209_s26, %s209_s26 }
  0x1f   :  { %155 = vmatprep.subr.mxu0 %v239_v0 }
  0x20   :  { %156 = vmatpush3.msra.mxu0 %v43_v3  ;;  %p216_p13 = por %p215_p12, %p214_p11 }
  0x21   :  { %157 = vmatprep.subr.mxu0 %v239_v0 }
  0x22   :  { %158 = vmatpush3.msra.mxu0 %v42_v4  ;;  %p217_p0 = pnand %p216_p13, %p210_p10 }
  0x23   :  { %160 = vmatmul.mubr.msk.f32.vlgmr.msra.gmra.mxu0 %vm53_vm1, %v41_v5 }
  0xe3   :  { %v123_v7 = vpop.f32.mrf.mxu0 }
  0xe4   :  { %v124_v8 = vadd.f32 %v144_v6, %v123_v7 }
  0xe5   :  { %v161_v9 = vpop.f32.mrf.mxu0 }
  0xe6   :  { %127 = vst [vmem:[#allocation7] sm:$0xff] %v124_v8 }
  0xe7   :  { %220 = shalt.err (!%p217_p0)
}
  0xe8   :  { %137 = dma.vmem_to_hbm [thread:$0]  %s135_s25, 128, %s277_s3, [#allocation4]  }
  0xe9   :  { %233 = dma.done.wait [#allocation4], 128  }
  0xea   :  { %234 = vsyncadd [#allocation4], 4294967168 }
  0xeb   :  { %141 = vsyncpa [#allocation3], 1 }
  0xec   :  { %142 = vsyncpa [#allocation6], 1 }
  0xed   :  { %143 = vsyncpa [#allocation4], 1 }

</bundles_post_ra>
